<compile_context>
chip_gen: v7x
topology: tpu7x:2x2x1
jax: 0.10.0
libtpu: 0.0.40
codegen_flags: <defaults>
</compile_context>

<pallas_src>
import jax
import jax.numpy as jnp
from jax.experimental import pallas as pl
from jax.experimental.pallas import tpu as pltpu


# ----------------------------------------------------------------------------- kernel


def _fused_mlp_kernel(xt_ref,            # (5, TM)   bf16, points on lanes
                      w1t_ref, t1_ref,   # (64, 5)   bf16, (64, 1)  f32
                      w2_ref,  t2_ref,   # (64, 128) bf16, (1, 128) f32
                      w3_ref,  t3_ref,   # (128,256) bf16, (1, 256) f32
                      o_ref):            # (TM, 256) out_dtype
    # layer 1, feature-major: (64,5) @ (5,TM) -> (64,TM) f32 acc, +shift, relu
    h = jnp.dot(w1t_ref[...], xt_ref[...], preferred_element_type=jnp.float32)
    h = jnp.maximum(h + t1_ref[...], 0.0)

    # flip to row-major while the intermediate is only 64 features wide
    h = h.T.astype(jnp.bfloat16)                                       # (TM, 64)

    # layer 2 row-major: (TM,64) @ (64,128) -> f32 acc, +shift, relu
    h = jnp.dot(h, w2_ref[...], preferred_element_type=jnp.float32)
    h = jnp.maximum(h + t2_ref[...], 0.0).astype(jnp.bfloat16)         # (TM, 128)

    # layer 3 row-major: (TM,128) @ (128,256) -> f32 acc, +shift, relu
    h = jnp.dot(h, w3_ref[...], preferred_element_type=jnp.float32)
    h = jnp.maximum(h + t3_ref[...], 0.0)                              # (TM, 256)

    # dropout: identity in eval mode
    o_ref[...] = h.astype(o_ref.dtype)


# ----------------------------------------------------------------------------- wrapper


def _round_up(a, b):
    return (a + b - 1) // b * b


def pointnet_feature_extractor(x, params, *, tm=4096, out_dtype=jnp.float32):
    """x: [N, 5] float32.  Returns [N, 256] in out_dtype (eval-mode forward).

    out_dtype=jnp.bfloat16 is the fast path (halves the dominant output-write
    HBM traffic); float32 (default) matches the torch module's output dtype.
    """
    N, C_in = x.shape
    assert C_in == 5
    w1t, t1, w2, t2, w3, t3 = params
    d3 = w3.shape[1]

    # Lane-dense bf16 input layout [5, N]: 5 features pad only to 8 sublanes and
    # points ride the 128-lane axis ([N,5] would pad 5 -> 128 lanes in HBM).
    # TODO(synk): produce x as [5, N] bf16 upstream to skip this transpose pass.
    xt = x.T.astype(jnp.bfloat16)

    # Row tile: large enough to amortize ~0.35us/grid-step pipeline overhead,
    # capped so the parallel grid keeps >= 2 steps (v7x: 2 TensorCores).
    tm_eff = max(256, min(tm, _round_up(pl.cdiv(N, 2), 256)))

    slice_back = False
    if N < tm_eff:
        # tiny-N path: one padded block keeps the in-kernel transpose tile-aligned
        xt = jnp.pad(xt, ((0, 0), (0, tm_eff - N)))
        n_rows, slice_back = tm_eff, True
    else:
        # ragged N: Pallas masks the partial last block (no extra pad/slice pass)
        n_rows = N

    grid = (pl.cdiv(n_rows, tm_eff),)

    # VMEM request sized from the actual footprint (double-buffered I/O tiles,
    # resident weights, live in-kernel intermediates) + headroom; stays well
    # under v7x's 64 MiB per-core VMEM at the default tm=4096 (~25 MiB).
    out_bytes = jnp.dtype(out_dtype).itemsize
    interm_bytes_per_point = 64 * 4 + 64 * 4 + 64 * 2 + 128 * 4 + 128 * 2 + 256 * 4
    vmem_bytes = (2 * tm_eff * d3 * out_bytes        # output tile, double-buffered
                  + 2 * 8 * tm_eff * 2               # bf16 input tile, double-buffered
                  + tm_eff * interm_bytes_per_point  # live intermediates (upper bound)
                  + (1 << 20)                        # weights + shifts (padded)
                  + (6 << 20))                       # compiler scratch headroom
    vmem_bytes = min(int(vmem_bytes), 64 * 1024 * 1024)

    def whole(shape):
        # full-array block, same block every grid step (weights stay resident)
        return pl.BlockSpec(shape, lambda i: (0, 0))

    out = pl.pallas_call(
        _fused_mlp_kernel,
        out_shape=jax.ShapeDtypeStruct((n_rows, d3), out_dtype),
        grid=grid,
        in_specs=[
            pl.BlockSpec((C_in, tm_eff), lambda i: (0, i)),   # lane-dense x tile
            whole(w1t.shape), whole(t1.shape),
            whole(w2.shape),  whole(t2.shape),
            whole(w3.shape),  whole(t3.shape),
        ],
        out_specs=pl.BlockSpec((tm_eff, d3), lambda i: (i, 0)),
        compiler_params=pltpu.CompilerParams(
            dimension_semantics=("parallel",),
            vmem_limit_bytes=vmem_bytes),
    )(xt, w1t, t1, w2, t2, w3, t3)

    return out[:N] if slice_back else out


# ----------------------------------------------------------------------------- params


def make_raw_params(key, eps=1e-5):
    """Deterministic raw parameters matching the torch module's layer shapes.

    Returns per-layer tuples (W[in,out], bias, gamma, beta, running_mean,
    running_var).  (torch stores Linear weight as [out,in]; we build [in,out].)
    """
    dims = [(5, 64), (64, 128), (128, 256)]
    keys = jax.random.split(key, 6 * len(dims))
    raw = []
    for li, (cin, cout) in enumerate(dims):
        kw, kb, kg, kbe, km, kv = keys[6 * li:6 * li + 6]
        bound = 1.0 / (cin ** 0.5)
        w = jax.random.uniform(kw, (cin, cout), jnp.float32, -bound, bound)
        b = jax.random.uniform(kb, (cout,), jnp.float32, -bound, bound)
        gamma = 1.0 + 0.1 * jax.random.normal(kg, (cout,), jnp.float32)
        beta = 0.1 * jax.random.normal(kbe, (cout,), jnp.float32)
        rmean = 0.1 * jax.random.normal(km, (cout,), jnp.float32)
        rvar = jnp.abs(1.0 + 0.1 * jax.random.normal(kv, (cout,), jnp.float32))
        raw.append((w, b, gamma, beta, rmean, rvar))
    return raw


def fold_params(raw, eps=1e-5, weight_dtype=jnp.bfloat16):
    """Fold eval-mode BN into the weights: y = x @ (W*s) + ((b - mean)*s + beta).

    Layer 1 is stored transposed ([64,5], shift [64,1]) because the kernel runs
    it feature-major; layers 2-3 stay row-major.  Weights are cast to bf16 for
    the MXU; shifts stay f32 (added to the f32 accumulator in-kernel).
    """
    folded = []
    for li, (w, b, gamma, beta, rmean, rvar) in enumerate(raw):
        scale = gamma / jnp.sqrt(rvar + eps)
        shift = (b - rmean) * scale + beta
        wf = (w * scale[None, :]).astype(weight_dtype)
        if li == 0:
            folded += [wf.T, shift.reshape(-1, 1)]
        else:
            folded += [wf, shift.reshape(1, -1)]
    return tuple(folded)


def reference_forward(x, raw, eps=1e-5, matmul_dtype=jnp.float32):
    """Pure-JAX eval-mode reference.  matmul_dtype=bf16 mirrors the kernel's
    operand rounding (f32 accumulation in both cases); dropout is identity."""
    h = x
    for (w, b, gamma, beta, rmean, rvar) in raw:
        scale = gamma / jnp.sqrt(rvar + eps)
        shift = (b - rmean) * scale + beta
        wf = (w * scale[None, :]).astype(matmul_dtype)
        h = jnp.dot(h.astype(matmul_dtype), wf,
                    preferred_element_type=jnp.float32) + shift
        h = jnp.maximum(h, 0.0)
    return h


# ----------------------------------------------------------------------------- demo


if __name__ == "__main__":
    key = jax.random.PRNGKey(0)
    kx, kx2, kp = jax.random.split(key, 3)

    raw = make_raw_params(kp)
    params = fold_params(raw)

    # small aligned shape (single-block path)
    N = 128
    x = jax.random.normal(kx, (N, 5), jnp.float32)
    out = jax.block_until_ready(pointnet_feature_extractor(x, params))
    assert out.shape == (N, 256) and out.dtype == jnp.float32
    ref_bf16 = reference_forward(x, raw, matmul_dtype=jnp.bfloat16)
    ref_f32 = reference_forward(x, raw, matmul_dtype=jnp.float32)
    assert jnp.allclose(out, ref_bf16, atol=2e-3, rtol=2e-3), "mismatch vs bf16-sim reference"
    assert jnp.allclose(out, ref_f32, atol=1e-1, rtol=1e-1), "mismatch vs f32 reference"

    # ragged N: multi-step grid with a Pallas-masked partial last block
    N2 = 300
    x2 = jax.random.normal(kx2, (N2, 5), jnp.float32)
    out2 = jax.block_until_ready(pointnet_feature_extractor(x2, params))
    assert out2.shape == (N2, 256)
    ref2 = reference_forward(x2, raw, matmul_dtype=jnp.bfloat16)
    assert jnp.allclose(out2, ref2, atol=2e-3, rtol=2e-3), "mismatch vs reference (ragged N)"

    # bf16-output fast path (halves the dominant HBM write traffic)
    out_bf16 = jax.block_until_ready(
        pointnet_feature_extractor(x, params, out_dtype=jnp.bfloat16))
    assert out_bf16.shape == (N, 256) and out_bf16.dtype == jnp.bfloat16
    assert jnp.allclose(out_bf16.astype(jnp.float32), ref_bf16, atol=1e-1, rtol=1e-1)

    print("KERNEL_OK")
</pallas_src>

<mosaic_0001>
module attributes {stable_mosaic.version = 11 : i64} {
  func.func @_fused_mlp_kernel(%arg0: i32, %arg1: memref<5x256xbf16, #tpu.memory_space<vmem>>, %arg2: memref<64x5xbf16, #tpu.memory_space<vmem>>, %arg3: memref<64x1xf32, #tpu.memory_space<vmem>>, %arg4: memref<64x128xbf16, #tpu.memory_space<vmem>>, %arg5: memref<1x128xf32, #tpu.memory_space<vmem>>, %arg6: memref<128x256xbf16, #tpu.memory_space<vmem>>, %arg7: memref<1x256xf32, #tpu.memory_space<vmem>>, %arg8: memref<256x256xf32, #tpu.memory_space<vmem>>) attributes {dimension_semantics = [#tpu.dimension_semantics<parallel>], iteration_bounds = array<i64: 1>, scalar_prefetch = 0 : i64, scratch_operands = 0 : i64, tpu.core_type = #tpu.core_type<tc>, window_params = [{transform_indices = @transform_0, window_bounds = array<i64: 5, 256>}, {pipeline_mode = #tpu.pipeline_mode<synchronous>, transform_indices = @transform_1, window_bounds = array<i64: 64, 5>}, {pipeline_mode = #tpu.pipeline_mode<synchronous>, transform_indices = @transform_2, window_bounds = array<i64: 64, 1>}, {pipeline_mode = #tpu.pipeline_mode<synchronous>, transform_indices = @transform_3, window_bounds = array<i64: 64, 128>}, {pipeline_mode = #tpu.pipeline_mode<synchronous>, transform_indices = @transform_4, window_bounds = array<i64: 1, 128>}, {pipeline_mode = #tpu.pipeline_mode<synchronous>, transform_indices = @transform_5, window_bounds = array<i64: 128, 256>}, {pipeline_mode = #tpu.pipeline_mode<synchronous>, transform_indices = @transform_6, window_bounds = array<i64: 1, 256>}, {transform_indices = @transform_7, window_bounds = array<i64: 256, 256>}]} {
    %c0 = arith.constant 0 : index
    %c0_0 = arith.constant 0 : index
    %0 = vector.load %arg2[%c0, %c0_0] : memref<64x5xbf16, #tpu.memory_space<vmem>>, vector<64x5xbf16>
    %c0_1 = arith.constant 0 : index
    %c0_2 = arith.constant 0 : index
    %1 = vector.load %arg1[%c0_1, %c0_2] : memref<5x256xbf16, #tpu.memory_space<vmem>>, vector<5x256xbf16>
    %cst = arith.constant dense<0.000000e+00> : vector<64x256xf32>
    %2 = tpu.matmul %0, %1, %cst {dimension_numbers = #tpu.dot_dimension_numbers<[1], [0], [0], [1], [0, 0, 1, 1], [], []>} : vector<64x5xbf16>, vector<5x256xbf16>, vector<64x256xf32> -> vector<64x256xf32>
    %c0_3 = arith.constant 0 : index
    %c0_4 = arith.constant 0 : index
    %3 = vector.load %arg3[%c0_3, %c0_4] : memref<64x1xf32, #tpu.memory_space<vmem>>, vector<64x1xf32>
    %4 = vector.broadcast %3 : vector<64x1xf32> to vector<64x256xf32>
    %5 = arith.addf %2, %4 : vector<64x256xf32>
    %cst_5 = arith.constant 0.000000e+00 : f32
    %6 = vector.broadcast %cst_5 : f32 to vector<64x256xf32>
    %7 = arith.maximumf %5, %6 : vector<64x256xf32>
    %8 = tpu.transpose %7, [1, 0] : vector<64x256xf32> -> vector<256x64xf32>
    %9 = arith.truncf %8 : vector<256x64xf32> to vector<256x64xbf16>
    %c0_6 = arith.constant 0 : index
    %c0_7 = arith.constant 0 : index
    %10 = vector.load %arg4[%c0_6, %c0_7] : memref<64x128xbf16, #tpu.memory_space<vmem>>, vector<64x128xbf16>
    %cst_8 = arith.constant dense<0.000000e+00> : vector<256x128xf32>
    %11 = tpu.matmul %9, %10, %cst_8 {dimension_numbers = #tpu.dot_dimension_numbers<[1], [0], [0], [1], [0, 0, 1, 1], [], []>} : vector<256x64xbf16>, vector<64x128xbf16>, vector<256x128xf32> -> vector<256x128xf32>
    %c0_9 = arith.constant 0 : index
    %c0_10 = arith.constant 0 : index
    %12 = vector.load %arg5[%c0_9, %c0_10] : memref<1x128xf32, #tpu.memory_space<vmem>>, vector<1x128xf32>
    %13 = vector.broadcast %12 : vector<1x128xf32> to vector<256x128xf32>
    %14 = arith.addf %11, %13 : vector<256x128xf32>
    %cst_11 = arith.constant 0.000000e+00 : f32
    %15 = vector.broadcast %cst_11 : f32 to vector<256x128xf32>
    %16 = arith.maximumf %14, %15 : vector<256x128xf32>
    %17 = arith.truncf %16 : vector<256x128xf32> to vector<256x128xbf16>
    %c0_12 = arith.constant 0 : index
    %c0_13 = arith.constant 0 : index
    %18 = vector.load %arg6[%c0_12, %c0_13] : memref<128x256xbf16, #tpu.memory_space<vmem>>, vector<128x256xbf16>
    %cst_14 = arith.constant dense<0.000000e+00> : vector<256x256xf32>
    %19 = tpu.matmul %17, %18, %cst_14 {dimension_numbers = #tpu.dot_dimension_numbers<[1], [0], [0], [1], [0, 0, 1, 1], [], []>} : vector<256x128xbf16>, vector<128x256xbf16>, vector<256x256xf32> -> vector<256x256xf32>
    %c0_15 = arith.constant 0 : index
    %c0_16 = arith.constant 0 : index
    %20 = vector.load %arg7[%c0_15, %c0_16] : memref<1x256xf32, #tpu.memory_space<vmem>>, vector<1x256xf32>
    %21 = vector.broadcast %20 : vector<1x256xf32> to vector<256x256xf32>
    %22 = arith.addf %19, %21 : vector<256x256xf32>
    %cst_17 = arith.constant 0.000000e+00 : f32
    %23 = vector.broadcast %cst_17 : f32 to vector<256x256xf32>
    %24 = arith.maximumf %22, %23 : vector<256x256xf32>
    %c0_18 = arith.constant 0 : index
    %c0_19 = arith.constant 0 : index
    %25 = vector.load %arg8[%c0_18, %c0_19] : memref<256x256xf32, #tpu.memory_space<vmem>>, vector<256x256xf32>
    tpu.vector_store %arg8[%c0_18, %c0_19], %24 {strides = array<i32>} : memref<256x256xf32, #tpu.memory_space<vmem>>, vector<256x256xf32>,
    return
  }
  func.func @transform_0(%arg0: i32) -> (i32, i32) {
    %c0_i32 = arith.constant 0 : i32
    %c0_i32_0 = arith.constant 0 : i32
    return %c0_i32, %arg0 : i32, i32
  }
  func.func @transform_1(%arg0: i32) -> (i32, i32) {
    %c0_i32 = arith.constant 0 : i32
    %c0_i32_0 = arith.constant 0 : i32
    %c0_i32_1 = arith.constant 0 : i32
    return %c0_i32, %c0_i32_0 : i32, i32
  }
  func.func @transform_2(%arg0: i32) -> (i32, i32) {
    %c0_i32 = arith.constant 0 : i32
    %c0_i32_0 = arith.constant 0 : i32
    %c0_i32_1 = arith.constant 0 : i32
    return %c0_i32, %c0_i32_0 : i32, i32
  }
  func.func @transform_3(%arg0: i32) -> (i32, i32) {
    %c0_i32 = arith.constant 0 : i32
    %c0_i32_0 = arith.constant 0 : i32
    %c0_i32_1 = arith.constant 0 : i32
    return %c0_i32, %c0_i32_0 : i32, i32
  }
  func.func @transform_4(%arg0: i32) -> (i32, i32) {
    %c0_i32 = arith.constant 0 : i32
    %c0_i32_0 = arith.constant 0 : i32
    %c0_i32_1 = arith.constant 0 : i32
    return %c0_i32, %c0_i32_0 : i32, i32
  }
  func.func @transform_5(%arg0: i32) -> (i32, i32) {
    %c0_i32 = arith.constant 0 : i32
    %c0_i32_0 = arith.constant 0 : i32
    %c0_i32_1 = arith.constant 0 : i32
    return %c0_i32, %c0_i32_0 : i32, i32
  }
  func.func @transform_6(%arg0: i32) -> (i32, i32) {
    %c0_i32 = arith.constant 0 : i32
    %c0_i32_0 = arith.constant 0 : i32
    %c0_i32_1 = arith.constant 0 : i32
    return %c0_i32, %c0_i32_0 : i32, i32
  }
  func.func @transform_7(%arg0: i32) -> (i32, i32) {
    %c0_i32 = arith.constant 0 : i32
    %c0_i32_0 = arith.constant 0 : i32
    return %arg0, %c0_i32 : i32, i32
  }
}

</mosaic_0001>

<bundles_post_ra>
// kernel: tpu_custom_call.1
= control target key start
LH: loop header
LB: loop body
LE: loop exit
PB: predicated region body
PF: predicated region fallthrough
CT: control target
= control target key end

     0   :  { %12 = vsyncpa [#allocation3], 0  ;;  %s1548_s0 = inlined_call_operand.vmem [shape: bf16[5,256], index: 0, kind: input, shape index: {}]   ;;  %s1549_s1 = inlined_call_operand.vmem [shape: bf16[64,5], index: 1, kind: input, shape index: {}]   ;;  %s1550_s2 = inlined_call_operand.vmem [shape: f32[64,1], index: 2, kind: input, shape index: {}]   ;;  %s1551_s3 = inlined_call_operand.vmem [shape: bf16[64,128], index: 3, kind: input, shape index: {}]   ;;  %s1552_s4 = inlined_call_operand.vmem [shape: f32[1,128], index: 4, kind: input, shape index: {}]   ;;  %s1553_s5 = inlined_call_operand.hbm [shape: bf16[128,256], index: 5, kind: input, shape index: {}]   ;;  %s1554_s6 = inlined_call_operand.vmem [shape: f32[1,256], index: 6, kind: input, shape index: {}]   ;;  %s1555_s7 = inlined_call_operand.hbm [shape: f32[256,256], index: 7, kind: output, shape index: {}]  }
   0x1   :  { %13 = vsyncpa [#allocation4], 0  ;;  %s1275_s24 = smov [#allocation2]   ;;  %s1227_s28 = scalar_lea.hbm %s1553_s5, 2048 }
   0x2   :  { %s29_s25 = sshll.u32 %s1275_s24, 4  ;;  %p1228_p0 = scmp.ne.s32.totalorder %s1553_s5, %s1227_s28  ;;  %s30_s25 = int_to_ptr.vmem [resolvable:$true] %s29_s25 }
   0x3   :  { %p1231_p1 = scmp.lt.u32.totalorder %s1227_s28, %s1553_s5 }
   0x5   :  { %p1233_p2 = pnand %p1231_p1, %p1228_p0 }
   0x7   :  { %1236 = shalt.err (!%p1233_p2)
}
   0x8   :  { %s1237_s10 = scalar_lea.vmem %s30_s25, 2048  ;;  %p1242_p4 = scmp.lt.s32.totalorder %s30_s25, %s30_s25 }
   0x9   :  { %p1238_p3 = scmp.ne.s32.totalorder %s30_s25, %s1237_s10  ;;  %p1243_p5 = scmp.lt.s32.totalorder %s1237_s10, %s1237_s10 }
   0xb   :  { %p1244_p6 = por %p1243_p5, %p1242_p4 }
   0xd   :  { %p1245_p7 = pnand %p1244_p6, %p1238_p3 }
   0xf   :  { %1248 = shalt.err (!%p1245_p7)
}
  0x10   :  { %s1276_s11 = smov 128   ;;  %s1277_s12 = smov 8  }
  0x11   :  { %35 = dma.hbm_to_vmem [thread:$0]  %s1553_s5, 2048, %s30_s25, [#allocation3], %s1276_s11, %s1276_s11, %s1277_s12  }
  0x12   :  { %1271 = dma.done.wait [#allocation3], 2048  }
  0x13   :  { %1272 = vsyncadd [#allocation3], 4294965248  ;;  %vm137_vm0 = vcmask 1041408   ;;  %v1278_v0 = vmov 0   ;;  %vm138_vm1 = vcmask 1042432   ;;  %v1279_v1 = vmov 65535  }
  0x14   :  { %179 = vmatprep.mubr.bf16.mxu0 %v1278_v0  ;;  %1191 = vset.pattern.permute.xlu0 %v1278_v0  ;;  %v139_v2 = vsel %vm137_vm0, 4294967295, %v1279_v1  ;;  %v50_v4 = vld [vmem:[%s1548_s0] sm:$0x77]  ;;  %v53_v11 = vld [vmem:[%s1550_s2 + $0x10] sm:$0xff]  ;;  %vm124_vm2 = vcmask 39936   ;;  %v52_v12 = vld [vmem:[%s1550_s2 + $0x8] sm:$0xff] }
  0x15   :  { %1192 = vset.pattern.permute.xlu1 %v1278_v0  ;;  %v140_v3 = vsel %vm138_vm1, %v139_v2, 0  ;;  %v1064_v5 = vcombine.high %v50_v4, %v50_v4  ;;  %v1063_v6 = vcombine.low %v50_v4, %v50_v4  ;;  %v51_v9 = vld [vmem:[%s1550_s2] sm:$0xff]  ;;  %v54_v13 = vld [vmem:[%s1550_s2 + $0x18] sm:$0xff]  ;;  %v56_v15 = vld [vmem:[%s1550_s2 + $0x28] sm:$0xff]  ;;  %vm355_vm3 = vcmask 523264  }
  0x16   :  { %v1195_v10 = vld [vmem:[%s1549_s1] sm:$0xff]   ;;  %61 = vperm.xlu0 %1191, %v51_v9   ;;  %71 = vperm.xlu1 %1192, %v53_v11   ;;  %v1196_v16 = vld [vmem:[%s1549_s1 + $0x8] sm:$0xff]   ;;  %v57_v17 = vld [vmem:[%s1550_s2 + $0x30] sm:$0xff] }
  0x17   :  { %v145_v7 = vand.u32 %v1064_v5, %v140_v3  ;;  %v142_v8 = vand.u32 %v1063_v6, %v140_v3  ;;  %v55_v14 = vld [vmem:[%s1550_s2 + $0x20] sm:$0xff]  ;;  %v58_v18 = vld [vmem:[%s1550_s2 + $0x38] sm:$0xff]  ;;  %v1197_v19 = vld [vmem:[%s1549_s1 + $0x10] sm:$0xff]  }
  0x18   :  { %v1198_v20 = vld [vmem:[%s1549_s1 + $0x18] sm:$0xff]   ;;  %v1199_v21 = vld [vmem:[%s1551_s3] sm:$0xff]   ;;  %v1200_v35 = vld [vmem:[%s1551_s3 + $0x8] sm:$0xff]  }
  0x19   :  { %147 = vmatprep.subr.bf16.mxu0 %v145_v7  ;;  %1126 = vmatprep.subr.bf16.mxu1 %v1199_v21  ;;  %v1201_v44 = vld [vmem:[%s1551_s3 + $0x10] sm:$0xff]   ;;  %v1202_v50 = vld [vmem:[%s1551_s3 + $0x18] sm:$0xff]  }
  0x1a   :  { %148 = vmatpush1.bf16.msra.mxu0 %v142_v8  ;;  %66 = vperm.xlu0 %1191, %v52_v12  }
  0x1b   :  { %76 = vperm.xlu1 %1192, %v54_v13   ;;  %1127 = vmatpush3.bf16.msra.mxu1 %v1199_v21  ;;  %v1206_v21 = vld [vmem:[#allocation2 + $0x10] ss:$8 sps:$4 sm:$0xff]  }
  0x1c   :  { %1128 = vmatprep.subr.bf16.mxu1 %v1200_v35 }
  0x1d   :  { %1065 = vmatmul.mubr.msk.bf16.vlgmr.msra.gmra.mrb[0].mxu0 %vm124_vm2, %v1195_v10 }
  0x1e   :  { %189 = vmatprep.mubr.bf16.mxu0 %v1278_v0  ;;  %81 = vperm.xlu0 %1191, %v55_v14  }
  0x1f   :  { %86 = vperm.xlu1 %1192, %v56_v15   ;;  %1129 = vmatpush3.bf16.msra.mxu1 %v1200_v35 }
  0x20   :  { %1130 = vmatprep.subr.bf16.mxu1 %v1201_v44 }
  0x22   :  { %91 = vperm.xlu0 %1191, %v57_v17  }
  0x23   :  { %96 = vperm.xlu1 %1192, %v58_v18   ;;  %1131 = vmatpush3.bf16.msra.mxu1 %v1201_v44  ;;  %v1203_v18 = vld [vmem:[#allocation2] ss:$8 sps:$4 sm:$0xff]  }
  0x24   :  { %1132 = vmatprep.subr.bf16.mxu1 %v1202_v50 }
  0x25   :  { %1066 = vmatmul.mubr.msk.bf16.gmra.mrb[4].mxu0 %vm124_vm2, %v1196_v16 }
  0x26   :  { %199 = vmatprep.mubr.bf16.mxu0 %v1278_v0 }
  0x27   :  { %1133 = vmatpush3.bf16.msra.mxu1 %v1202_v50 }
  0x2d   :  { %1067 = vmatmul.mubr.msk.bf16.gmra.mrb[8].mxu0 %vm124_vm2, %v1197_v19  ;;  %v1205_v19 = vld [vmem:[#allocation2 + $0x4] ss:$8 sps:$4 sm:$0xff]  }
  0x2e   :  { %209 = vmatprep.mubr.bf16.mxu0 %v1278_v0  ;;  %721 = vmatprep.subr.bf16.mxu0 %v1205_v19 }
  0x2f   :  { %1166 = vmatprep.subr.bf16.mxu1 %v1205_v19  ;;  %722 = vmatpush1.bf16.msra.mxu0 %v1203_v18  ;;  %v1417_v19 = vld [vmem:[%s1552_s4] ss:$0 sm:$0xff] }
  0x35   :  { %1068 = vmatmul.mubr.msk.bf16.gmra.mrb[12].mxu0 %vm124_vm2, %v1198_v20  ;;  %v1208_v20 = vld [vmem:[#allocation2 + $0x14] ss:$8 sps:$4 sm:$0xff]  }
  0x36   :  { %753 = vmatprep.mubr.bf16.mxu0 %v1278_v0  ;;  %723 = vmatprep.subr.bf16.mxu0 %v1208_v20 }
  0x37   :  { %724 = vmatpush1.bf16.msra.mxu0 %v1206_v21 }
  0x95   :  { %v62_v22 = vpop.permute.xlu0 %61  ;;  %v72_v32 = vpop.permute.xlu1 %71 }
  0x99   :  { %v67_v26 = vpop.permute.xlu0 %66 }
  0x9a   :  { %v77_v41 = vpop.permute.xlu1 %76 }
  0x9d   :  { %v82_v52 = vpop.permute.xlu0 %81 }
  0x9e   :  { %v87_v57 = vpop.permute.xlu1 %86 }
  0xa1   :  { %v92_v3 = vpop.permute.xlu0 %91 }
  0xa2   :  { %v97_v8 = vpop.permute.xlu1 %96 }
  0xf0   :  { %v181_v23 = vpop.f32.mrb[0].mxu0 }
  0xf1   :  { %v182_v24 = vadd.f32 %v181_v23, %v62_v22  ;;  %v183_v25 = vpop.f32.mrb[1].mxu0  ;;  %v1209_v23 = vld [vmem:[#allocation2 + $0x20] ss:$8 sps:$4 sm:$0xff]  }
  0xf2   :  { %v184_v27 = vadd.f32 %v183_v25, %v62_v22  ;;  %v185_v28 = vpop.f32.mrb[2].mxu0  ;;  %v1211_v22 = vld [vmem:[#allocation2 + $0x24] ss:$8 sps:$4 sm:$0xff]   ;;  %v1212_v25 = vld [vmem:[#allocation2 + $0x30] ss:$8 sps:$4 sm:$0xff]  }
  0xf3   :  { %v220_v29 = vmax.f32 %v182_v24, 0.0  ;;  %v186_v30 = vadd.f32 %v185_v28, %v67_v26  ;;  %v187_v31 = vpop.f32.mrb[3].mxu0  ;;  %725 = vmatprep.subr.bf16.mxu0 %v1211_v22  ;;  %v1214_v24 = vld [vmem:[#allocation2 + $0x34] ss:$8 sps:$4 sm:$0xff]  }
  0xf4   :  { %v221_v33 = vmax.f32 %v184_v27, 0.0  ;;  %v188_v34 = vadd.f32 %v187_v31, %v67_v26  ;;  %726 = vmatpush1.bf16.msra.mxu0 %v1209_v23  ;;  %v1217_v26 = vld [vmem:[#allocation2 + $0x44] ss:$8 sps:$4 sm:$0xff]   ;;  %v1215_v27 = vld [vmem:[#allocation2 + $0x40] ss:$8 sps:$4 sm:$0xff]  }
  0xf5   :  { %236 = vxpose.xlu0.b32.start [1/8] (short) %v220_v29, 128  ;;  %v222_v36 = vmax.f32 %v186_v30, 0.0  ;;  %727 = vmatprep.subr.bf16.mxu0 %v1214_v24  ;;  %v1220_v28 = vld [vmem:[#allocation2 + $0x54] ss:$8 sps:$4 sm:$0xff]   ;;  %v1218_v29 = vld [vmem:[#allocation2 + $0x50] ss:$8 sps:$4 sm:$0xff]  }
  0xf6   :  { %268 = vxpose.xlu1.b32.start [1/8] (short) %v221_v33, 128  ;;  %v223_v37 = vmax.f32 %v188_v34, 0.0 }
  0xf8   :  { %v191_v38 = vpop.f32.mrb[4].mxu0  ;;  %728 = vmatpush1.bf16.msra.mxu0 %v1212_v25 }
  0xf9   :  { %v192_v39 = vadd.f32 %v191_v38, %v72_v32  ;;  %v193_v40 = vpop.f32.mrb[5].mxu0  ;;  %237 = vxpose.xlu0.b32.cont [2/8] (short) %v222_v36, 128  ;;  %729 = vmatprep.subr.bf16.mxu0 %v1217_v26 }
  0xfa   :  { %v194_v42 = vadd.f32 %v193_v40, %v72_v32  ;;  %v195_v43 = vpop.f32.mrb[6].mxu0  ;;  %269 = vxpose.xlu1.b32.cont [2/8] (short) %v223_v37, 128 }
  0xfb   :  { %v224_v45 = vmax.f32 %v192_v39, 0.0  ;;  %v196_v46 = vadd.f32 %v195_v43, %v77_v41  ;;  %v197_v47 = vpop.f32.mrb[7].mxu0 }
  0xfc   :  { %v225_v48 = vmax.f32 %v194_v42, 0.0  ;;  %v198_v49 = vadd.f32 %v197_v47, %v77_v41  ;;  %730 = vmatpush1.bf16.msra.mxu0 %v1215_v27 }
  0xfd   :  { %238 = vxpose.xlu0.b32.cont [3/8] (short) %v224_v45, 128  ;;  %v226_v51 = vmax.f32 %v196_v46, 0.0  ;;  %731 = vmatprep.subr.bf16.mxu0 %v1220_v28 }
  0xfe   :  { %270 = vxpose.xlu1.b32.cont [3/8] (short) %v225_v48, 128  ;;  %v227_v53 = vmax.f32 %v198_v49, 0.0 }
 0x100   :  { %v201_v54 = vpop.f32.mrb[8].mxu0  ;;  %732 = vmatpush1.bf16.msra.mxu0 %v1218_v29 }
 0x101   :  { %v202_v55 = vadd.f32 %v201_v54, %v82_v52  ;;  %v203_v56 = vpop.f32.mrb[9].mxu0  ;;  %239 = vxpose.xlu0.b32.cont [4/8] (short) %v226_v51, 128 }
 0x102   :  { %v204_v58 = vadd.f32 %v203_v56, %v82_v52  ;;  %v205_v59 = vpop.f32.mrb[10].mxu0  ;;  %271 = vxpose.xlu1.b32.cont [4/8] (short) %v227_v53, 128 }
 0x103   :  { %v228_v60 = vmax.f32 %v202_v55, 0.0  ;;  %v206_v61 = vadd.f32 %v205_v59, %v87_v57  ;;  %v207_v62 = vpop.f32.mrb[11].mxu0 }
 0x104   :  { %v229_v63 = vmax.f32 %v204_v58, 0.0  ;;  %v208_v1 = vadd.f32 %v207_v62, %v87_v57 }
 0x105   :  { %240 = vxpose.xlu0.b32.cont [5/8] (short) %v228_v60, 128  ;;  %v230_v2 = vmax.f32 %v206_v61, 0.0 }
 0x106   :  { %272 = vxpose.xlu1.b32.cont [5/8] (short) %v229_v63, 128  ;;  %v231_v4 = vmax.f32 %v208_v1, 0.0 }
 0x108   :  { %v211_v5 = vpop.f32.mrb[12].mxu0 }
 0x109   :  { %v212_v6 = vadd.f32 %v211_v5, %v92_v3  ;;  %v213_v7 = vpop.f32.mrb[13].mxu0  ;;  %241 = vxpose.xlu0.b32.cont [6/8] (short) %v230_v2, 128 }
 0x10a   :  { %v214_v9 = vadd.f32 %v213_v7, %v92_v3  ;;  %v215_v10 = vpop.f32.mrb[14].mxu0  ;;  %273 = vxpose.xlu1.b32.cont [6/8] (short) %v231_v4, 128 }
 0x10b   :  { %v232_v11 = vmax.f32 %v212_v6, 0.0  ;;  %v216_v12 = vadd.f32 %v215_v10, %v97_v8  ;;  %v217_v13 = vpop.f32.mrb[15].mxu0 }
 0x10c   :  { %v233_v14 = vmax.f32 %v214_v9, 0.0  ;;  %v218_v15 = vadd.f32 %v217_v13, %v97_v8 }
 0x10d   :  { %242 = vxpose.xlu0.b32.cont [7/8] (short) %v232_v11, 128  ;;  %v234_v16 = vmax.f32 %v216_v12, 0.0 }
 0x10e   :  { %274 = vxpose.xlu1.b32.cont [7/8] (short) %v233_v14, 128  ;;  %v235_v17 = vmax.f32 %v218_v15, 0.0  ;;  %v1223_v15 = vld [vmem:[#allocation2 + $0x64] ss:$8 sps:$4 sm:$0xff]  }
 0x10f   :  { %733 = vmatprep.subr.bf16.mxu0 %v1223_v15 }
 0x111   :  { %243 = vxpose.xlu0.b32.end [8/8] (short) %v234_v16, 128  ;;  %v1221_v16 = vld [vmem:[#allocation2 + $0x60] ss:$8 sps:$4 sm:$0xff]  }
 0x112   :  { %275 = vxpose.xlu1.b32.end [8/8] (short) %v235_v17, 128  ;;  %734 = vmatpush1.bf16.msra.mxu0 %v1221_v16  ;;  %v1226_v17 = vld [vmem:[#allocation2 + $0x74] ss:$8 sps:$4 sm:$0xff]  }
 0x113   :  { %735 = vmatprep.subr.bf16.mxu0 %v1226_v17 }
 0x175   :  { %v252_v30 = vpop.trf.xlu0 }
 0x176   :  { %v284_v31 = vpop.trf.xlu1 }
 0x179   :  { %v253_v32 = vpop.trf.xlu0 }
 0x17a   :  { %v300_v33 = vpack.c.bf16 %v253_v32, %v252_v30  ;;  %v285_v34 = vpop.trf.xlu1 }
 0x17b   :  { %v308_v2 = vpack.c.bf16 %v285_v34, %v284_v31 }
 0x17c   :  { %1134 = vmatprep.mubr.msk.bf16.mxu1 %vm355_vm3, %v300_v33 }
 0x17d   :  { %v254_v35 = vpop.trf.xlu0 }
 0x17e   :  { %v286_v36 = vpop.trf.xlu1 }
 0x181   :  { %v255_v37 = vpop.trf.xlu0 }
 0x182   :  { %v301_v38 = vpack.c.bf16 %v255_v37, %v254_v35  ;;  %v287_v40 = vpop.trf.xlu1 }
 0x183   :  { %v309_v4 = vpack.c.bf16 %v287_v40, %v286_v36 }
 0x184   :  { %1135 = vmatmul.mubr.msk.bf16.vlgmr.msra.gmra.mrb[0].mxu1 %vm355_vm3, %v301_v38 }
 0x185   :  { %v256_v39 = vpop.trf.xlu0  ;;  %1174 = vmatpush1.bf16.msra.mxu1 %v1203_v18  ;;  %v1224_v18 = vld [vmem:[#allocation2 + $0x70] ss:$8 sps:$4 sm:$0xff]  }
 0x186   :  { %1167 = vmatprep.subr.bf16.mxu1 %v1208_v20  ;;  %v288_v43 = vpop.trf.xlu1  ;;  %736 = vmatpush1.bf16.msra.mxu0 %v1224_v18 }
 0x189   :  { %v257_v41 = vpop.trf.xlu0  ;;  %1175 = vmatpush1.bf16.msra.mxu1 %v1206_v21 }
 0x18a   :  { %v302_v42 = vpack.c.bf16 %v257_v41, %v256_v39  ;;  %1168 = vmatprep.subr.bf16.mxu1 %v1211_v22  ;;  %v289_v46 = vpop.trf.xlu1 }
 0x18b   :  { %v310_v5 = vpack.c.bf16 %v289_v46, %v288_v43 }
 0x18c   :  { %1138 = vmatprep.mubr.msk.bf16.mxu1 %vm355_vm3, %v302_v42 }
 0x18d   :  { %v258_v44 = vpop.trf.xlu0  ;;  %1176 = vmatpush1.bf16.msra.mxu1 %v1209_v23 }
 0x18e   :  { %1169 = vmatprep.subr.bf16.mxu1 %v1214_v24  ;;  %v290_v49 = vpop.trf.xlu1 }
 0x191   :  { %v259_v45 = vpop.trf.xlu0  ;;  %1177 = vmatpush1.bf16.msra.mxu1 %v1212_v25 }
 0x192   :  { %v303_v47 = vpack.c.bf16 %v259_v45, %v258_v44  ;;  %1170 = vmatprep.subr.bf16.mxu1 %v1217_v26  ;;  %v291_v53 = vpop.trf.xlu1 }
 0x193   :  { %v311_v8 = vpack.c.bf16 %v291_v53, %v290_v49 }
 0x194   :  { %1139 = vmatmul.mubr.msk.bf16.gmra.mrb[4].mxu1 %vm355_vm3, %v303_v47 }
 0x195   :  { %v260_v48 = vpop.trf.xlu0  ;;  %1178 = vmatpush1.bf16.msra.mxu1 %v1215_v27 }
 0x196   :  { %1171 = vmatprep.subr.bf16.mxu1 %v1220_v28  ;;  %v292_v56 = vpop.trf.xlu1 }
 0x199   :  { %v261_v50 = vpop.trf.xlu0  ;;  %1179 = vmatpush1.bf16.msra.mxu1 %v1218_v29 }
 0x19a   :  { %v304_v51 = vpack.c.bf16 %v261_v50, %v260_v48  ;;  %v293_v59 = vpop.trf.xlu1  ;;  %1172 = vmatprep.subr.bf16.mxu1 %v1223_v15 }
 0x19b   :  { %v312_v9 = vpack.c.bf16 %v293_v59, %v292_v56 }
 0x19c   :  { %1142 = vmatprep.mubr.msk.bf16.mxu1 %vm355_vm3, %v304_v51 }
 0x19d   :  { %v262_v52 = vpop.trf.xlu0  ;;  %1180 = vmatpush1.bf16.msra.mxu1 %v1221_v16 }
 0x19e   :  { %v294_v62 = vpop.trf.xlu1  ;;  %1173 = vmatprep.subr.bf16.mxu1 %v1226_v17 }
 0x1a1   :  { %v263_v54 = vpop.trf.xlu0  ;;  %1181 = vmatpush1.bf16.msra.mxu1 %v1224_v18 }
 0x1a2   :  { %v305_v55 = vpack.c.bf16 %v263_v54, %v262_v52  ;;  %v295_v3 = vpop.trf.xlu1 }
 0x1a3   :  { %v313_v12 = vpack.c.bf16 %v295_v3, %v294_v62 }
 0x1a4   :  { %1143 = vmatmul.mubr.msk.bf16.gmra.mrb[8].mxu1 %vm355_vm3, %v305_v55 }
 0x1a5   :  { %v264_v57 = vpop.trf.xlu0 }
 0x1a6   :  { %v296_v6 = vpop.trf.xlu1 }
 0x1a9   :  { %v265_v58 = vpop.trf.xlu0 }
 0x1aa   :  { %v306_v60 = vpack.c.bf16 %v265_v58, %v264_v57  ;;  %v297_v7 = vpop.trf.xlu1 }
 0x1ab   :  { %v314_v11 = vpack.c.bf16 %v297_v7, %v296_v6 }
 0x1ac   :  { %1146 = vmatprep.mubr.msk.bf16.mxu1 %vm355_vm3, %v306_v60 }
 0x1ad   :  { %v266_v61 = vpop.trf.xlu0 }
 0x1ae   :  { %v298_v10 = vpop.trf.xlu1 }
 0x1b1   :  { %v267_v63 = vpop.trf.xlu0 }
 0x1b2   :  { %v307_v1 = vpack.c.bf16 %v267_v63, %v266_v61  ;;  %v299_v13 = vpop.trf.xlu1 }
 0x1b3   :  { %v315_v14 = vpack.c.bf16 %v299_v13, %v298_v10 }
 0x1b4   :  { %1147 = vmatmul.mubr.msk.bf16.gmra.mrb[12].mxu1 %vm355_vm3, %v307_v1 }
 0x1b5   :  { %1150 = vmatprep.mubr.msk.bf16.mxu1 %vm355_vm3, %v308_v2 }
 0x1bc   :  { %1151 = vmatmul.mubr.msk.bf16.gmra.mrb[16].mxu1 %vm355_vm3, %v309_v4 }
 0x1bd   :  { %1154 = vmatprep.mubr.msk.bf16.mxu1 %vm355_vm3, %v310_v5 }
 0x1c4   :  { %1155 = vmatmul.mubr.msk.bf16.gmra.mrb[20].mxu1 %vm355_vm3, %v311_v8 }
 0x1c5   :  { %1158 = vmatprep.mubr.msk.bf16.mxu1 %vm355_vm3, %v312_v9 }
 0x1cc   :  { %1159 = vmatmul.mubr.msk.bf16.gmra.mrb[24].mxu1 %vm355_vm3, %v313_v12 }
 0x1cd   :  { %1162 = vmatprep.mubr.msk.bf16.mxu1 %vm355_vm3, %v314_v11 }
 0x1d4   :  { %1163 = vmatmul.mubr.msk.bf16.gmra.mrb[28].mxu1 %vm355_vm3, %v315_v14 }
 0x1d5   :  { %863 = vmatprep.mubr.bf16.mxu1 %v1278_v0 }
 0x257   :  { %v1136_v20 = vpop.f32.mrb[0].mxu1 }
 0x258   :  { %v447_v21 = vadd.f32 %v1136_v20, %v1417_v19  ;;  %v438_v22 = vpop.f32.mrb[1].mxu1 }
 0x259   :  { %v439_v23 = vadd.f32 %v1417_v19, %v438_v22  ;;  %v1137_v24 = vpop.f32.mrb[2].mxu1 }
 0x25a   :  { %v450_v25 = vadd.f32 %v1137_v24, %v1417_v19  ;;  %v441_v26 = vpop.f32.mrb[3].mxu1  ;;  %v567_v28 = vmax.f32 %v447_v21, 0.0 }
 0x25b   :  { %v442_v27 = vadd.f32 %v1417_v19, %v441_v26  ;;  %v565_v30 = vmax.f32 %v439_v23, 0.0 }
 0x25c   :  { %v568_v29 = vmax.f32 %v450_v25, 0.0 }
 0x25d   :  { %v566_v31 = vmax.f32 %v442_v27, 0.0 }
 0x25e   :  { %v598_v32 = vpack.c.bf16 %v568_v29, %v567_v28 }
 0x25f   :  { %v597_v33 = vpack.c.bf16 %v566_v31, %v565_v30 }
 0x261   :  { %754 = vmatmul.mubr.bf16.vlgmr.msra.gmra.mrb[16].mxu0 %v597_v33 }
 0x262   :  { %763 = vmatprep.mubr.bf16.mxu0 %v1278_v0 }
 0x267   :  { %v1140_v34 = vpop.f32.mrb[4].mxu1 }
 0x268   :  { %v463_v35 = vadd.f32 %v1140_v34, %v1417_v19  ;;  %v454_v36 = vpop.f32.mrb[5].mxu1 }
 0x269   :  { %v455_v37 = vadd.f32 %v1417_v19, %v454_v36  ;;  %v1141_v38 = vpop.f32.mrb[6].mxu1  ;;  %764 = vmatmul.mubr.bf16.gmra.mrb[20].mxu0 %v598_v32 }
 0x26a   :  { %v466_v39 = vadd.f32 %v1141_v38, %v1417_v19  ;;  %v457_v40 = vpop.f32.mrb[7].mxu1  ;;  %773 = vmatprep.mubr.bf16.mxu0 %v1278_v0  ;;  %v571_v42 = vmax.f32 %v463_v35, 0.0 }
 0x26b   :  { %v458_v41 = vadd.f32 %v1417_v19, %v457_v40  ;;  %v569_v44 = vmax.f32 %v455_v37, 0.0 }
 0x26c   :  { %v572_v43 = vmax.f32 %v466_v39, 0.0 }
 0x26d   :  { %v570_v45 = vmax.f32 %v458_v41, 0.0 }
 0x26e   :  { %v600_v46 = vpack.c.bf16 %v572_v43, %v571_v42 }
 0x26f   :  { %v599_v47 = vpack.c.bf16 %v570_v45, %v569_v44 }
 0x271   :  { %774 = vmatmul.mubr.bf16.gmra.mrb[24].mxu0 %v599_v47 }
 0x272   :  { %783 = vmatprep.mubr.bf16.mxu0 %v1278_v0 }
 0x277   :  { %v1144_v48 = vpop.f32.mrb[8].mxu1 }
 0x278   :  { %v479_v49 = vadd.f32 %v1144_v48, %v1417_v19  ;;  %v470_v50 = vpop.f32.mrb[9].mxu1 }
 0x279   :  { %v471_v51 = vadd.f32 %v1417_v19, %v470_v50  ;;  %v1145_v52 = vpop.f32.mrb[10].mxu1  ;;  %784 = vmatmul.mubr.bf16.gmra.mrb[28].mxu0 %v600_v46 }
 0x27a   :  { %v482_v53 = vadd.f32 %v1145_v52, %v1417_v19  ;;  %v473_v54 = vpop.f32.mrb[11].mxu1  ;;  %793 = vmatprep.mubr.bf16.mxu0 %v1278_v0  ;;  %v575_v56 = vmax.f32 %v479_v49, 0.0 }
 0x27b   :  { %v474_v55 = vadd.f32 %v1417_v19, %v473_v54  ;;  %v573_v58 = vmax.f32 %v471_v51, 0.0 }
 0x27c   :  { %v576_v57 = vmax.f32 %v482_v53, 0.0 }
 0x27d   :  { %v574_v59 = vmax.f32 %v474_v55, 0.0 }
 0x27e   :  { %v602_v60 = vpack.c.bf16 %v576_v57, %v575_v56 }
 0x27f   :  { %v601_v61 = vpack.c.bf16 %v574_v59, %v573_v58 }
 0x281   :  { %794 = vmatmul.mubr.bf16.gmra.mrb[32].mxu0 %v601_v61 }
 0x282   :  { %803 = vmatprep.mubr.bf16.mxu0 %v1278_v0 }
 0x287   :  { %v1148_v62 = vpop.f32.mrb[12].mxu1 }
 0x288   :  { %v495_v63 = vadd.f32 %v1148_v62, %v1417_v19  ;;  %v486_v1 = vpop.f32.mrb[13].mxu1 }
 0x289   :  { %v487_v2 = vadd.f32 %v1417_v19, %v486_v1  ;;  %v1149_v3 = vpop.f32.mrb[14].mxu1  ;;  %804 = vmatmul.mubr.bf16.gmra.mrb[36].mxu0 %v602_v60 }
 0x28a   :  { %v498_v4 = vadd.f32 %v1149_v3, %v1417_v19  ;;  %v489_v5 = vpop.f32.mrb[15].mxu1  ;;  %813 = vmatprep.mubr.bf16.mxu0 %v1278_v0  ;;  %v579_v7 = vmax.f32 %v495_v63, 0.0 }
 0x28b   :  { %v490_v6 = vadd.f32 %v1417_v19, %v489_v5  ;;  %v577_v9 = vmax.f32 %v487_v2, 0.0 }
 0x28c   :  { %v580_v8 = vmax.f32 %v498_v4, 0.0 }
 0x28d   :  { %v578_v10 = vmax.f32 %v490_v6, 0.0 }
 0x28e   :  { %v604_v11 = vpack.c.bf16 %v580_v8, %v579_v7  ;;  %v631_v7 = vlaneseq }
 0x28f   :  { %v603_v12 = vpack.c.bf16 %v578_v10, %v577_v9  ;;  %v1152_v13 = vpop.f32.mrb[16].mxu1  ;;  %v629_v10 = vld [vmem:[%s1554_s6] sm:$0x3]  ;;  %s1280_s6 = smov [#allocation5]  }
 0x290   :  { %v511_v14 = vadd.f32 %v1152_v13, %v1417_v19  ;;  %v502_v15 = vpop.f32.mrb[17].mxu1  ;;  %v632_v8 = vshrl.u32 %v631_v7, 7  ;;  %s1047_s22 = sshll.u32 %s1280_s6, 4  ;;  %s1048_s22 = int_to_ptr.vmem [resolvable:$true] %s1047_s22 }
 0x291   :  { %v503_v16 = vadd.f32 %v1417_v19, %v502_v15  ;;  %v1153_v17 = vpop.f32.mrb[18].mxu1  ;;  %814 = vmatmul.mubr.bf16.gmra.mrb[40].mxu0 %v603_v12  ;;  %s1249_s23 = scalar_lea.vmem %s1048_s22, 8192  ;;  %p1254_p9 = scmp.lt.s32.totalorder %s1048_s22, %s1048_s22 }
 0x292   :  { %v514_v18 = vadd.f32 %v1153_v17, %v1417_v19  ;;  %v505_v20 = vpop.f32.mrb[19].mxu1  ;;  %823 = vmatprep.mubr.bf16.mxu0 %v1278_v0  ;;  %v583_v22 = vmax.f32 %v511_v14, 0.0  ;;  %v633_v9 = vsub.s32 0, %v632_v8  ;;  %p1250_p8 = scmp.ne.s32.totalorder %s1048_s22, %s1249_s23  ;;  %p1255_p10 = scmp.lt.s32.totalorder %s1249_s23, %s1249_s23 }
 0x293   :  { %v506_v21 = vadd.f32 %v1417_v19, %v505_v20  ;;  %v581_v24 = vmax.f32 %v503_v16, 0.0 }
 0x294   :  { %v584_v23 = vmax.f32 %v514_v18, 0.0  ;;  %p1256_p11 = por %p1255_p10, %p1254_p9 }
 0x295   :  { %v582_v25 = vmax.f32 %v506_v21, 0.0 }
 0x296   :  { %v606_v26 = vpack.c.bf16 %v584_v23, %v583_v22  ;;  %p1257_p12 = pnand %p1256_p11, %p1250_p8 }
 0x297   :  { %v605_v27 = vpack.c.bf16 %v582_v25, %v581_v24  ;;  %v1156_v28 = vpop.f32.mrb[20].mxu1 }
 0x298   :  { %v527_v29 = vadd.f32 %v1156_v28, %v1417_v19  ;;  %v518_v30 = vpop.f32.mrb[21].mxu1 }
 0x299   :  { %v519_v31 = vadd.f32 %v1417_v19, %v518_v30  ;;  %v1157_v32 = vpop.f32.mrb[22].mxu1  ;;  %824 = vmatmul.mubr.bf16.gmra.mrb[44].mxu0 %v604_v11  ;;  %v1468_v11 = vrot.slane %v629_v10, %v633_v9 }
 0x29a   :  { %v530_v33 = vadd.f32 %v1157_v32, %v1417_v19  ;;  %v521_v34 = vpop.f32.mrb[23].mxu1  ;;  %833 = vmatprep.mubr.bf16.mxu0 %v1278_v0  ;;  %v587_v36 = vmax.f32 %v527_v29, 0.0 }
 0x29b   :  { %v522_v35 = vadd.f32 %v1417_v19, %v521_v34  ;;  %v585_v38 = vmax.f32 %v519_v31, 0.0 }
 0x29c   :  { %v588_v37 = vmax.f32 %v530_v33, 0.0 }
 0x29d   :  { %v586_v39 = vmax.f32 %v522_v35, 0.0 }
 0x29e   :  { %v608_v40 = vpack.c.bf16 %v588_v37, %v587_v36 }
 0x29f   :  { %v607_v41 = vpack.c.bf16 %v586_v39, %v585_v38  ;;  %v1160_v42 = vpop.f32.mrb[24].mxu1 }
 0x2a0   :  { %v543_v43 = vadd.f32 %v1160_v42, %v1417_v19  ;;  %v534_v44 = vpop.f32.mrb[25].mxu1  ;;  %864 = vmatmul.mubr.bf16.vlgmr.msra.gmra.mrb[32].mxu1 %v608_v40 }
 0x2a1   :  { %v535_v45 = vadd.f32 %v1417_v19, %v534_v44  ;;  %v1161_v46 = vpop.f32.mrb[26].mxu1  ;;  %834 = vmatmul.mubr.bf16.gmra.mrb[48].mxu0 %v605_v27  ;;  %873 = vmatprep.mubr.bf16.mxu1 %v1278_v0 }
 0x2a2   :  { %v546_v47 = vadd.f32 %v1161_v46, %v1417_v19  ;;  %v537_v48 = vpop.f32.mrb[27].mxu1  ;;  %843 = vmatprep.mubr.bf16.mxu0 %v1278_v0  ;;  %v591_v50 = vmax.f32 %v543_v43, 0.0 }
 0x2a3   :  { %v538_v49 = vadd.f32 %v1417_v19, %v537_v48  ;;  %v589_v52 = vmax.f32 %v535_v45, 0.0 }
 0x2a4   :  { %v592_v51 = vmax.f32 %v546_v47, 0.0 }
 0x2a5   :  { %v590_v53 = vmax.f32 %v538_v49, 0.0 }
 0x2a6   :  { %v610_v54 = vpack.c.bf16 %v592_v51, %v591_v50 }
 0x2a7   :  { %v609_v55 = vpack.c.bf16 %v590_v53, %v589_v52  ;;  %v1164_v56 = vpop.f32.mrb[28].mxu1 }
 0x2a8   :  { %v559_v57 = vadd.f32 %v1164_v56, %v1417_v19  ;;  %v550_v58 = vpop.f32.mrb[29].mxu1 }
 0x2a9   :  { %v551_v59 = vadd.f32 %v1417_v19, %v550_v58  ;;  %844 = vmatmul.mubr.bf16.gmra.mrb[52].mxu0 %v606_v26  ;;  %874 = vmatmul.mubr.bf16.gmra.mrb[36].mxu1 %v609_v55  ;;  %v1165_v60 = vpop.f32.mrb[30].mxu1 }
 0x2aa   :  { %v595_v61 = vmax.f32 %v559_v57, 0.0  ;;  %v562_v62 = vadd.f32 %v1165_v60, %v1417_v19  ;;  %v553_v63 = vpop.f32.mrb[31].mxu1  ;;  %853 = vmatprep.mubr.bf16.mxu0 %v1278_v0  ;;  %883 = vmatprep.mubr.bf16.mxu1 %v1278_v0 }
 0x2ab   :  { %v593_v1 = vmax.f32 %v551_v59, 0.0  ;;  %v554_v2 = vadd.f32 %v1417_v19, %v553_v63  ;;  %v637_v19 = vsub.s32 1, %v632_v8 }
 0x2ac   :  { %v596_v3 = vmax.f32 %v562_v62, 0.0 }
 0x2ad   :  { %v594_v4 = vmax.f32 %v554_v2, 0.0  ;;  %v1470_v12 = vrot.slane %v629_v10, %v637_v19 }
 0x2ae   :  { %v612_v5 = vpack.c.bf16 %v596_v3, %v595_v61 }
 0x2af   :  { %v611_v6 = vpack.c.bf16 %v594_v4, %v593_v1 }
 0x2b1   :  { %854 = vmatmul.mubr.bf16.gmra.mrb[56].mxu0 %v607_v41  ;;  %884 = vmatmul.mubr.bf16.gmra.mrb[40].mxu1 %v610_v54 }
 0x2b2   :  { %893 = vmatprep.mubr.bf16.mxu1 %v1278_v0 }
 0x2b9   :  { %894 = vmatmul.mubr.bf16.gmra.mrb[44].mxu1 %v611_v6 }
 0x2ba   :  { %903 = vmatprep.mubr.bf16.mxu1 %v1278_v0 }
 0x2c1   :  { %904 = vmatmul.mubr.bf16.gmra.mrb[48].mxu1 %v612_v5 }
 0x334   :  { %v755_v13 = vpop.f32.mrb[16].mxu0 }
 0x335   :  { %v756_v14 = vadd.f32 %v755_v13, %v1468_v11  ;;  %v757_v15 = vpop.f32.mrb[17].mxu0 }
 0x336   :  { %v758_v16 = vadd.f32 %v757_v15, %v1470_v12  ;;  %v759_v0 = vpop.f32.mrb[18].mxu0 }
 0x337   :  { %v914_v17 = vmax.f32 %v756_v14, 0.0  ;;  %v760_v18 = vadd.f32 %v759_v0, %v1468_v11  ;;  %v761_v20 = vpop.f32.mrb[19].mxu0 }
 0x338   :  { %v915_v21 = vmax.f32 %v758_v16, 0.0  ;;  %v762_v22 = vadd.f32 %v761_v20, %v1470_v12 }
 0x339   :  { %978 = vst [vmem:[#allocation5] sm:$0xff] %v914_v17  ;;  %v916_v23 = vmax.f32 %v760_v18, 0.0 }
 0x33a   :  { %979 = vst [vmem:[#allocation5 + $0x8] sm:$0xff] %v915_v21  ;;  %v917_v24 = vmax.f32 %v762_v22, 0.0 }
 0x33b   :  { %980 = vst [vmem:[#allocation5 + $0x10] sm:$0xff] %v916_v23 }
 0x33c   :  { %981 = vst [vmem:[#allocation5 + $0x18] sm:$0xff] %v917_v24  ;;  %v765_v25 = vpop.f32.mrb[20].mxu0 }
 0x33d   :  { %v766_v26 = vadd.f32 %v765_v25, %v1468_v11  ;;  %v767_v27 = vpop.f32.mrb[21].mxu0 }
 0x33e   :  { %v768_v28 = vadd.f32 %v767_v27, %v1470_v12  ;;  %v769_v29 = vpop.f32.mrb[22].mxu0 }
 0x33f   :  { %v918_v30 = vmax.f32 %v766_v26, 0.0  ;;  %v770_v31 = vadd.f32 %v769_v29, %v1468_v11  ;;  %v771_v32 = vpop.f32.mrb[23].mxu0 }
 0x340   :  { %v919_v33 = vmax.f32 %v768_v28, 0.0  ;;  %v772_v34 = vadd.f32 %v771_v32, %v1470_v12 }
 0x341   :  { %982 = vst [vmem:[#allocation5 + $0x20] sm:$0xff] %v918_v30  ;;  %v920_v35 = vmax.f32 %v770_v31, 0.0 }
 0x342   :  { %983 = vst [vmem:[#allocation5 + $0x28] sm:$0xff] %v919_v33  ;;  %v921_v36 = vmax.f32 %v772_v34, 0.0 }
 0x343   :  { %984 = vst [vmem:[#allocation5 + $0x30] sm:$0xff] %v920_v35 }
 0x344   :  { %985 = vst [vmem:[#allocation5 + $0x38] sm:$0xff] %v921_v36  ;;  %v775_v37 = vpop.f32.mrb[24].mxu0 }
 0x345   :  { %v776_v38 = vadd.f32 %v775_v37, %v1468_v11  ;;  %v777_v39 = vpop.f32.mrb[25].mxu0 }
 0x346   :  { %v778_v40 = vadd.f32 %v777_v39, %v1470_v12  ;;  %v779_v41 = vpop.f32.mrb[26].mxu0 }
 0x347   :  { %v922_v42 = vmax.f32 %v776_v38, 0.0  ;;  %v780_v43 = vadd.f32 %v779_v41, %v1468_v11  ;;  %v781_v44 = vpop.f32.mrb[27].mxu0 }
 0x348   :  { %v923_v45 = vmax.f32 %v778_v40, 0.0  ;;  %v782_v46 = vadd.f32 %v781_v44, %v1470_v12 }
 0x349   :  { %986 = vst [vmem:[#allocation5 + $0x40] sm:$0xff] %v922_v42  ;;  %v924_v47 = vmax.f32 %v780_v43, 0.0 }
 0x34a   :  { %987 = vst [vmem:[#allocation5 + $0x48] sm:$0xff] %v923_v45  ;;  %v925_v48 = vmax.f32 %v782_v46, 0.0 }
 0x34b   :  { %988 = vst [vmem:[#allocation5 + $0x50] sm:$0xff] %v924_v47 }
 0x34c   :  { %989 = vst [vmem:[#allocation5 + $0x58] sm:$0xff] %v925_v48  ;;  %v785_v49 = vpop.f32.mrb[28].mxu0 }
 0x34d   :  { %v786_v50 = vadd.f32 %v785_v49, %v1468_v11  ;;  %v787_v51 = vpop.f32.mrb[29].mxu0 }
 0x34e   :  { %v788_v52 = vadd.f32 %v787_v51, %v1470_v12  ;;  %v789_v53 = vpop.f32.mrb[30].mxu0 }
 0x34f   :  { %v926_v54 = vmax.f32 %v786_v50, 0.0  ;;  %v790_v55 = vadd.f32 %v789_v53, %v1468_v11  ;;  %v791_v56 = vpop.f32.mrb[31].mxu0 }
 0x350   :  { %v927_v57 = vmax.f32 %v788_v52, 0.0  ;;  %v792_v58 = vadd.f32 %v791_v56, %v1470_v12 }
 0x351   :  { %990 = vst [vmem:[#allocation5 + $0x60] sm:$0xff] %v926_v54  ;;  %v928_v59 = vmax.f32 %v790_v55, 0.0 }
 0x352   :  { %991 = vst [vmem:[#allocation5 + $0x68] sm:$0xff] %v927_v57  ;;  %v929_v60 = vmax.f32 %v792_v58, 0.0 }
 0x353   :  { %992 = vst [vmem:[#allocation5 + $0x70] sm:$0xff] %v928_v59 }
 0x354   :  { %993 = vst [vmem:[#allocation5 + $0x78] sm:$0xff] %v929_v60  ;;  %v795_v61 = vpop.f32.mrb[32].mxu0 }
 0x355   :  { %v796_v62 = vadd.f32 %v795_v61, %v1468_v11  ;;  %v797_v63 = vpop.f32.mrb[33].mxu0 }
 0x356   :  { %v798_v1 = vadd.f32 %v797_v63, %v1470_v12  ;;  %v799_v2 = vpop.f32.mrb[34].mxu0 }
 0x357   :  { %v930_v3 = vmax.f32 %v796_v62, 0.0  ;;  %v800_v4 = vadd.f32 %v799_v2, %v1468_v11  ;;  %v801_v5 = vpop.f32.mrb[35].mxu0 }
 0x358   :  { %v931_v6 = vmax.f32 %v798_v1, 0.0  ;;  %v802_v7 = vadd.f32 %v801_v5, %v1470_v12 }
 0x359   :  { %994 = vst [vmem:[#allocation5 + $0x80] sm:$0xff] %v930_v3  ;;  %v932_v8 = vmax.f32 %v800_v4, 0.0 }
 0x35a   :  { %995 = vst [vmem:[#allocation5 + $0x88] sm:$0xff] %v931_v6  ;;  %v933_v9 = vmax.f32 %v802_v7, 0.0 }
 0x35b   :  { %996 = vst [vmem:[#allocation5 + $0x90] sm:$0xff] %v932_v8 }
 0x35c   :  { %997 = vst [vmem:[#allocation5 + $0x98] sm:$0xff] %v933_v9  ;;  %v805_v10 = vpop.f32.mrb[36].mxu0 }
 0x35d   :  { %v806_v19 = vadd.f32 %v805_v10, %v1468_v11  ;;  %v807_v13 = vpop.f32.mrb[37].mxu0 }
 0x35e   :  { %v808_v14 = vadd.f32 %v807_v13, %v1470_v12  ;;  %v809_v15 = vpop.f32.mrb[38].mxu0 }
 0x35f   :  { %v934_v16 = vmax.f32 %v806_v19, 0.0  ;;  %v810_v0 = vadd.f32 %v809_v15, %v1468_v11  ;;  %v811_v17 = vpop.f32.mrb[39].mxu0 }
 0x360   :  { %v935_v18 = vmax.f32 %v808_v14, 0.0  ;;  %v812_v20 = vadd.f32 %v811_v17, %v1470_v12 }
 0x361   :  { %998 = vst [vmem:[#allocation5 + $0xa0] sm:$0xff] %v934_v16  ;;  %v936_v21 = vmax.f32 %v810_v0, 0.0 }
 0x362   :  { %999 = vst [vmem:[#allocation5 + $0xa8] sm:$0xff] %v935_v18  ;;  %v937_v22 = vmax.f32 %v812_v20, 0.0 }
 0x363   :  { %1000 = vst [vmem:[#allocation5 + $0xb0] sm:$0xff] %v936_v21 }
 0x364   :  { %1001 = vst [vmem:[#allocation5 + $0xb8] sm:$0xff] %v937_v22  ;;  %v815_v23 = vpop.f32.mrb[40].mxu0 }
 0x365   :  { %v816_v24 = vadd.f32 %v815_v23, %v1468_v11  ;;  %v817_v25 = vpop.f32.mrb[41].mxu0 }
 0x366   :  { %v818_v26 = vadd.f32 %v817_v25, %v1470_v12  ;;  %v819_v27 = vpop.f32.mrb[42].mxu0 }
 0x367   :  { %v938_v28 = vmax.f32 %v816_v24, 0.0  ;;  %v820_v29 = vadd.f32 %v819_v27, %v1468_v11  ;;  %v821_v30 = vpop.f32.mrb[43].mxu0 }
 0x368   :  { %v939_v31 = vmax.f32 %v818_v26, 0.0  ;;  %v822_v32 = vadd.f32 %v821_v30, %v1470_v12 }
 0x369   :  { %1002 = vst [vmem:[#allocation5 + $0xc0] sm:$0xff] %v938_v28  ;;  %v940_v33 = vmax.f32 %v820_v29, 0.0 }
 0x36a   :  { %1003 = vst [vmem:[#allocation5 + $0xc8] sm:$0xff] %v939_v31  ;;  %v941_v34 = vmax.f32 %v822_v32, 0.0 }
 0x36b   :  { %1004 = vst [vmem:[#allocation5 + $0xd0] sm:$0xff] %v940_v33 }
 0x36c   :  { %1005 = vst [vmem:[#allocation5 + $0xd8] sm:$0xff] %v941_v34  ;;  %v825_v35 = vpop.f32.mrb[44].mxu0 }
 0x36d   :  { %v826_v36 = vadd.f32 %v825_v35, %v1468_v11  ;;  %v827_v37 = vpop.f32.mrb[45].mxu0 }
 0x36e   :  { %v828_v38 = vadd.f32 %v827_v37, %v1470_v12  ;;  %v829_v39 = vpop.f32.mrb[46].mxu0 }
 0x36f   :  { %v942_v40 = vmax.f32 %v826_v36, 0.0  ;;  %v830_v41 = vadd.f32 %v829_v39, %v1468_v11  ;;  %v831_v42 = vpop.f32.mrb[47].mxu0 }
 0x370   :  { %v943_v43 = vmax.f32 %v828_v38, 0.0  ;;  %v832_v44 = vadd.f32 %v831_v42, %v1470_v12 }
 0x371   :  { %1006 = vst [vmem:[#allocation5 + $0xe0] sm:$0xff] %v942_v40  ;;  %v944_v45 = vmax.f32 %v830_v41, 0.0 }
 0x372   :  { %1007 = vst [vmem:[#allocation5 + $0xe8] sm:$0xff] %v943_v43  ;;  %v945_v46 = vmax.f32 %v832_v44, 0.0 }
 0x373   :  { %1008 = vst [vmem:[#allocation5 + $0xf0] sm:$0xff] %v944_v45  ;;  %v865_v47 = vpop.f32.mrb[32].mxu1 }
 0x374   :  { %1009 = vst [vmem:[#allocation5 + $0xf8] sm:$0xff] %v945_v46  ;;  %v866_v48 = vadd.f32 %v865_v47, %v1468_v11  ;;  %v835_v49 = vpop.f32.mrb[48].mxu0  ;;  %v867_v50 = vpop.f32.mrb[33].mxu1 }
 0x375   :  { %v836_v51 = vadd.f32 %v835_v49, %v1468_v11  ;;  %v868_v52 = vadd.f32 %v867_v50, %v1470_v12  ;;  %v837_v53 = vpop.f32.mrb[49].mxu0  ;;  %v869_v54 = vpop.f32.mrb[34].mxu1 }
 0x376   :  { %v958_v55 = vmax.f32 %v866_v48, 0.0  ;;  %v838_v56 = vadd.f32 %v837_v53, %v1470_v12  ;;  %v870_v57 = vadd.f32 %v869_v54, %v1468_v11  ;;  %v839_v58 = vpop.f32.mrb[50].mxu0  ;;  %v871_v59 = vpop.f32.mrb[35].mxu1 }
 0x377   :  { %v946_v60 = vmax.f32 %v836_v51, 0.0  ;;  %v959_v61 = vmax.f32 %v868_v52, 0.0  ;;  %v840_v62 = vadd.f32 %v839_v58, %v1468_v11  ;;  %v872_v63 = vadd.f32 %v871_v59, %v1470_v12  ;;  %v841_v1 = vpop.f32.mrb[51].mxu0 }
 0x378   :  { %1022 = vst [vmem:[#allocation5 + $0x160] sm:$0xff] %v958_v55  ;;  %v947_v2 = vmax.f32 %v838_v56, 0.0  ;;  %v960_v3 = vmax.f32 %v870_v57, 0.0  ;;  %v842_v4 = vadd.f32 %v841_v1, %v1470_v12 }
 0x379   :  { %1010 = vst [vmem:[#allocation5 + $0x100] sm:$0xff] %v946_v60  ;;  %1023 = vst [vmem:[#allocation5 + $0x168] sm:$0xff] %v959_v61  ;;  %v948_v5 = vmax.f32 %v840_v62, 0.0  ;;  %v961_v6 = vmax.f32 %v872_v63, 0.0 }
 0x37a   :  { %1011 = vst [vmem:[#allocation5 + $0x108] sm:$0xff] %v947_v2  ;;  %1024 = vst [vmem:[#allocation5 + $0x170] sm:$0xff] %v960_v3  ;;  %v949_v7 = vmax.f32 %v842_v4, 0.0 }
 0x37b   :  { %1012 = vst [vmem:[#allocation5 + $0x110] sm:$0xff] %v948_v5  ;;  %1025 = vst [vmem:[#allocation5 + $0x178] sm:$0xff] %v961_v6 }
 0x37c   :  { %1013 = vst [vmem:[#allocation5 + $0x118] sm:$0xff] %v949_v7  ;;  %v845_v8 = vpop.f32.mrb[52].mxu0  ;;  %v875_v9 = vpop.f32.mrb[36].mxu1 }
 0x37d   :  { %v846_v10 = vadd.f32 %v845_v8, %v1468_v11  ;;  %v876_v19 = vadd.f32 %v875_v9, %v1468_v11  ;;  %v847_v13 = vpop.f32.mrb[53].mxu0  ;;  %v877_v14 = vpop.f32.mrb[37].mxu1 }
 0x37e   :  { %v848_v15 = vadd.f32 %v847_v13, %v1470_v12  ;;  %v878_v16 = vadd.f32 %v877_v14, %v1470_v12  ;;  %v849_v0 = vpop.f32.mrb[54].mxu0  ;;  %v879_v17 = vpop.f32.mrb[38].mxu1 }
 0x37f   :  { %v950_v18 = vmax.f32 %v846_v10, 0.0  ;;  %v962_v20 = vmax.f32 %v876_v19, 0.0  ;;  %v850_v21 = vadd.f32 %v849_v0, %v1468_v11  ;;  %v880_v22 = vadd.f32 %v879_v17, %v1468_v11  ;;  %v851_v23 = vpop.f32.mrb[55].mxu0  ;;  %v881_v24 = vpop.f32.mrb[39].mxu1 }
 0x380   :  { %v951_v25 = vmax.f32 %v848_v15, 0.0  ;;  %v963_v26 = vmax.f32 %v878_v16, 0.0  ;;  %v852_v27 = vadd.f32 %v851_v23, %v1470_v12  ;;  %v882_v28 = vadd.f32 %v881_v24, %v1470_v12 }
 0x381   :  { %1014 = vst [vmem:[#allocation5 + $0x120] sm:$0xff] %v950_v18  ;;  %1026 = vst [vmem:[#allocation5 + $0x180] sm:$0xff] %v962_v20  ;;  %v952_v29 = vmax.f32 %v850_v21, 0.0  ;;  %v964_v30 = vmax.f32 %v880_v22, 0.0 }
 0x382   :  { %1015 = vst [vmem:[#allocation5 + $0x128] sm:$0xff] %v951_v25  ;;  %1027 = vst [vmem:[#allocation5 + $0x188] sm:$0xff] %v963_v26  ;;  %v953_v31 = vmax.f32 %v852_v27, 0.0  ;;  %v965_v32 = vmax.f32 %v882_v28, 0.0 }
 0x383   :  { %1016 = vst [vmem:[#allocation5 + $0x130] sm:$0xff] %v952_v29  ;;  %1028 = vst [vmem:[#allocation5 + $0x190] sm:$0xff] %v964_v30 }
 0x384   :  { %1017 = vst [vmem:[#allocation5 + $0x138] sm:$0xff] %v953_v31  ;;  %1029 = vst [vmem:[#allocation5 + $0x198] sm:$0xff] %v965_v32  ;;  %v855_v33 = vpop.f32.mrb[56].mxu0  ;;  %v885_v34 = vpop.f32.mrb[40].mxu1 }
 0x385   :  { %v856_v35 = vadd.f32 %v855_v33, %v1468_v11  ;;  %v886_v36 = vadd.f32 %v885_v34, %v1468_v11  ;;  %v857_v37 = vpop.f32.mrb[57].mxu0  ;;  %v887_v38 = vpop.f32.mrb[41].mxu1 }
 0x386   :  { %v858_v39 = vadd.f32 %v857_v37, %v1470_v12  ;;  %v888_v40 = vadd.f32 %v887_v38, %v1470_v12  ;;  %v859_v41 = vpop.f32.mrb[58].mxu0  ;;  %v889_v42 = vpop.f32.mrb[42].mxu1 }
 0x387   :  { %v954_v43 = vmax.f32 %v856_v35, 0.0  ;;  %v966_v44 = vmax.f32 %v886_v36, 0.0  ;;  %v860_v45 = vadd.f32 %v859_v41, %v1468_v11  ;;  %v890_v46 = vadd.f32 %v889_v42, %v1468_v11  ;;  %v861_v47 = vpop.f32.mrb[59].mxu0  ;;  %v891_v48 = vpop.f32.mrb[43].mxu1 }
 0x388   :  { %v955_v49 = vmax.f32 %v858_v39, 0.0  ;;  %v967_v50 = vmax.f32 %v888_v40, 0.0  ;;  %v862_v51 = vadd.f32 %v861_v47, %v1470_v12  ;;  %v892_v52 = vadd.f32 %v891_v48, %v1470_v12 }
 0x389   :  { %1018 = vst [vmem:[#allocation5 + $0x140] sm:$0xff] %v954_v43  ;;  %1030 = vst [vmem:[#allocation5 + $0x1a0] sm:$0xff] %v966_v44  ;;  %v956_v53 = vmax.f32 %v860_v45, 0.0  ;;  %v968_v54 = vmax.f32 %v890_v46, 0.0 }
 0x38a   :  { %1019 = vst [vmem:[#allocation5 + $0x148] sm:$0xff] %v955_v49  ;;  %1031 = vst [vmem:[#allocation5 + $0x1a8] sm:$0xff] %v967_v50  ;;  %v957_v55 = vmax.f32 %v862_v51, 0.0  ;;  %v969_v56 = vmax.f32 %v892_v52, 0.0 }
 0x38b   :  { %1020 = vst [vmem:[#allocation5 + $0x150] sm:$0xff] %v956_v53  ;;  %1032 = vst [vmem:[#allocation5 + $0x1b0] sm:$0xff] %v968_v54 }
 0x38c   :  { %1021 = vst [vmem:[#allocation5 + $0x158] sm:$0xff] %v957_v55  ;;  %1033 = vst [vmem:[#allocation5 + $0x1b8] sm:$0xff] %v969_v56  ;;  %v895_v57 = vpop.f32.mrb[44].mxu1 }
 0x38d   :  { %v896_v58 = vadd.f32 %v895_v57, %v1468_v11  ;;  %v897_v59 = vpop.f32.mrb[45].mxu1 }
 0x38e   :  { %v898_v60 = vadd.f32 %v897_v59, %v1470_v12  ;;  %v899_v61 = vpop.f32.mrb[46].mxu1 }
 0x38f   :  { %v970_v62 = vmax.f32 %v896_v58, 0.0  ;;  %v900_v63 = vadd.f32 %v899_v61, %v1468_v11  ;;  %v901_v1 = vpop.f32.mrb[47].mxu1 }
 0x390   :  { %v971_v2 = vmax.f32 %v898_v60, 0.0  ;;  %v902_v3 = vadd.f32 %v901_v1, %v1470_v12 }
 0x391   :  { %1034 = vst [vmem:[#allocation5 + $0x1c0] sm:$0xff] %v970_v62  ;;  %v972_v4 = vmax.f32 %v900_v63, 0.0 }
 0x392   :  { %1035 = vst [vmem:[#allocation5 + $0x1c8] sm:$0xff] %v971_v2  ;;  %v973_v5 = vmax.f32 %v902_v3, 0.0 }
 0x393   :  { %1036 = vst [vmem:[#allocation5 + $0x1d0] sm:$0xff] %v972_v4 }
 0x394   :  { %1037 = vst [vmem:[#allocation5 + $0x1d8] sm:$0xff] %v973_v5  ;;  %v905_v6 = vpop.f32.mrb[48].mxu1 }
 0x395   :  { %v906_v7 = vadd.f32 %v905_v6, %v1468_v11  ;;  %v907_v8 = vpop.f32.mrb[49].mxu1 }
 0x396   :  { %v908_v9 = vadd.f32 %v907_v8, %v1470_v12  ;;  %v909_v10 = vpop.f32.mrb[50].mxu1 }
 0x397   :  { %v974_v19 = vmax.f32 %v906_v7, 0.0  ;;  %v910_v13 = vadd.f32 %v909_v10, %v1468_v11  ;;  %v911_v14 = vpop.f32.mrb[51].mxu1 }
 0x398   :  { %v975_v15 = vmax.f32 %v908_v9, 0.0  ;;  %v912_v16 = vadd.f32 %v911_v14, %v1470_v12 }
 0x399   :  { %1038 = vst [vmem:[#allocation5 + $0x1e0] sm:$0xff] %v974_v19  ;;  %v976_v0 = vmax.f32 %v910_v13, 0.0 }
 0x39a   :  { %1039 = vst [vmem:[#allocation5 + $0x1e8] sm:$0xff] %v975_v15  ;;  %v977_v17 = vmax.f32 %v912_v16, 0.0 }
 0x39b   :  { %1040 = vst [vmem:[#allocation5 + $0x1f0] sm:$0xff] %v976_v0 }
 0x39c   :  { %1041 = vst [vmem:[#allocation5 + $0x1f8] sm:$0xff] %v977_v17 }
 0x39d   :  { %1260 = shalt.err (!%p1257_p12)
}
 0x39e   :  { %s1261_s26 = scalar_lea.hbm %s1555_s7, 8192 }
 0x39f   :  { %p1262_p13 = scmp.ne.s32.totalorder %s1555_s7, %s1261_s26  ;;  %p1265_p0 = scmp.lt.u32.totalorder %s1261_s26, %s1555_s7 }
 0x3a1   :  { %p1267_p1 = pnand %p1265_p0, %p1262_p13 }
 0x3a3   :  { %1270 = shalt.err (!%p1267_p1)
}
 0x3a4   :  { %s1281_s8 = smov 256   ;;  %s1282_s9 = smov 16  }
 0x3a5   :  { %1053 = dma.vmem_to_hbm [thread:$0]  %s1048_s22, 8192, %s1555_s7, [#allocation4], %s1281_s8, %s1281_s8, %s1282_s9  }
 0x3a6   :  { %1273 = dma.done.wait [#allocation4], 8192  }
 0x3a7   :  { %1274 = vsyncadd [#allocation4], 4294959104 }
 0x3a8   :  { %1057 = vsyncpa [#allocation3], 1 }
 0x3a9   :  { %1058 = vsyncpa [#allocation4], 1 }

</bundles_post_ra>
